<compile_context>
chip_gen: v6e
topology: v6e:2x2x1
jax: 0.10.0
libtpu: 0.0.40
codegen_flags: <defaults>
</compile_context>

<pallas_src>
import functools

import jax
import jax.numpy as jnp
from jax.experimental import pallas as pl
from jax.experimental.pallas import tpu as pltpu

EPS = 1e-5  # eps used by cppcuda_bn.bn_forward_conv_parallel

# Budgets are in f32-equivalent elements (4 bytes each) so they stay safe when a bf16
# input is upcast to f32 inside the kernel.
MAX_BLOCK_ELEMS = (8 << 20) // 4        # ~8 MiB f32 per x block (two-pass path)
FUSED_MAX_SLAB_ELEMS = (4 << 20) // 4   # ~4 MiB f32 per (N, c_tile, HW) slab (fused path)
MAX_C_TILE = 256
VMEM_LIMIT_BYTES = 48 * 1024 * 1024     # < v7x 64 MiB physical, >> 16/32 MiB defaults


# ---------------------------------------------------------------------------
# Tile selection helpers (all Python ints, evaluated at trace time).
# ---------------------------------------------------------------------------
def _divisors_multiple_of(dim, align):
    """Ascending divisors of `dim` that are multiples of `align`, plus `dim` itself."""
    cands = {dim}
    d = align
    while d <= dim:
        if dim % d == 0:
            cands.add(d)
        d += align
    return sorted(cands)


def _pick_tile(dim, align, max_elems, prefer_split=False):
    """Largest legal block size for `dim` under `max_elems`.

    Legal = divisor of `dim` that is a multiple of `align`, or the full dim.
    If `prefer_split`, prefer sizes leaving >= 2 blocks (v7x megacore).
    Falls back to the smallest legal size if nothing fits under the cap.
    """
    cands = _divisors_multiple_of(dim, align)
    if prefer_split:
        split = [c for c in cands if c <= max_elems and dim // c >= 2]
        if split:
            return max(split)
    under = [c for c in cands if c <= max_elems]
    if under:
        return max(under)
    return min(cands)


# ---------------------------------------------------------------------------
# Kernels
# ---------------------------------------------------------------------------
def _make_stats_kernel(inv_count, eps):
    def kernel(x_ref, gamma_ref, beta_ref, scale_ref, bias_ref):
        # x_ref: (n_blk, c_tile, hw_tile).  scale_ref/bias_ref (c_tile, 1) are the
        # resident accumulators: they hold sum / sum(x^2) during the reduction sweep
        # and are converted in place to the fused scale / bias on the last step.
        n = pl.program_id(1)
        t = pl.program_id(2)

        @pl.when((n == 0) & (t == 0))
        def _init():
            scale_ref[...] = jnp.zeros_like(scale_ref)
            bias_ref[...] = jnp.zeros_like(bias_ref)

        x = x_ref[...].astype(jnp.float32)
        part_sum = jnp.sum(x, axis=2, keepdims=True)        # (n_blk, c_tile, 1)
        part_sq = jnp.sum(x * x, axis=2, keepdims=True)     # (n_blk, c_tile, 1)
        scale_ref[...] += jnp.sum(part_sum, axis=0)          # (c_tile, 1)
        bias_ref[...] += jnp.sum(part_sq, axis=0)            # (c_tile, 1)

        @pl.when((n == pl.num_programs(1) - 1) & (t == pl.num_programs(2) - 1))
        def _finalize():
            mean = scale_ref[...] * inv_count
            var = jnp.maximum(bias_ref[...] * inv_count - mean * mean, 0.0)
            inv_std = jax.lax.rsqrt(var + eps)
            g = gamma_ref[...].astype(jnp.float32)
            b = beta_ref[...].astype(jnp.float32)
            scale_ref[...] = g * inv_std
            bias_ref[...] = b - mean * (g * inv_std)

    return kernel


def _normalize_kernel(x_ref, scale_ref, bias_ref, o_ref):
    # x_ref/o_ref: (n_blk, c_tile, hw_tile); scale/bias: (c_tile, 1) resident.
    x = x_ref[...].astype(jnp.float32)
    scale = scale_ref[...][None, :, :]                        # (1, c_tile, 1)
    bias = bias_ref[...][None, :, :]
    o_ref[...] = (x * scale + bias).astype(o_ref.dtype)


def _make_fused_kernel(inv_count, eps):
    def kernel(x_ref, gamma_ref, beta_ref, o_ref):
        # x_ref/o_ref: (N, c_tile, HW) - whole per-channel-group slab resident.
        x = x_ref[...].astype(jnp.float32)
        part_sum = jnp.sum(x, axis=2, keepdims=True)          # (N, c_tile, 1)
        part_sq = jnp.sum(x * x, axis=2, keepdims=True)
        s = jnp.sum(part_sum, axis=0)                         # (c_tile, 1)
        sq = jnp.sum(part_sq, axis=0)
        mean = s * inv_count
        var = jnp.maximum(sq * inv_count - mean * mean, 0.0)
        inv_std = jax.lax.rsqrt(var + eps)
        g = gamma_ref[...].astype(jnp.float32)
        b = beta_ref[...].astype(jnp.float32)
        scale = (g * inv_std)[None, :, :]                     # (1, c_tile, 1)
        bias = (b - mean * (g * inv_std))[None, :, :]
        o_ref[...] = (x * scale + bias).astype(o_ref.dtype)

    return kernel


# ---------------------------------------------------------------------------
# Wrapper
# ---------------------------------------------------------------------------
@functools.partial(jax.jit, static_argnames=("eps", "force_two_pass"))
def batchnorm_parallel_2d(x, gamma, beta, eps=EPS, force_two_pass=False):
    """x: (N, C, H, W); gamma/beta: (C,).  Returns normalized (N, C, H, W)."""
    N, C, H, W = x.shape
    HW = H * W
    inv_count = 1.0 / float(N * HW)
    c_align = 16 if x.dtype.itemsize == 2 else 8

    # Free reshape (contiguous dims merged) - no transpose, no extra HBM pass.
    x3 = x.reshape(N, C, HW)
    g2 = gamma.reshape(C, 1)
    b2 = beta.reshape(C, 1)

    def cparams(sems):
        return pltpu.CompilerParams(
            dimension_semantics=sems, vmem_limit_bytes=VMEM_LIMIT_BYTES
        )

    # ---- Fused single-read path: whole (N, c_tile, HW) slab per grid step. ----
    max_c_fused = FUSED_MAX_SLAB_ELEMS // max(N * HW, 1)
    if not force_two_pass and max_c_fused >= 1:
        c_tile = _pick_tile(C, c_align, max_c_fused, prefer_split=True)
        if N * c_tile * HW <= FUSED_MAX_SLAB_ELEMS:
            c_tiles = C // c_tile
            out3 = pl.pallas_call(
                _make_fused_kernel(inv_count, eps),
                out_shape=jax.ShapeDtypeStruct((N, C, HW), x.dtype),
                grid_spec=pltpu.PrefetchScalarGridSpec(
                    num_scalar_prefetch=0,
                    grid=(c_tiles,),
                    in_specs=[
                        pl.BlockSpec((N, c_tile, HW), lambda c: (0, c, 0)),
                        pl.BlockSpec((c_tile, 1), lambda c: (c, 0)),
                        pl.BlockSpec((c_tile, 1), lambda c: (c, 0)),
                    ],
                    out_specs=pl.BlockSpec((N, c_tile, HW), lambda c: (0, c, 0)),
                ),
                compiler_params=cparams(("parallel",)),
            )(x3, g2, b2)
            return out3.reshape(N, C, H, W)

    # ---- Two-pass path (stats sweep + elementwise normalize): 2R + 1W traffic. ----
    c_tile = _pick_tile(C, c_align, MAX_C_TILE, prefer_split=True)
    hw_tile = _pick_tile(HW, 128, max(MAX_BLOCK_ELEMS // c_tile, 128))
    n_blk = 1
    for d in range(1, N + 1):  # fold N to keep per-step DMA large for small HW
        if N % d == 0 and d * c_tile * hw_tile <= MAX_BLOCK_ELEMS:
            n_blk = d
    c_tiles = C // c_tile
    hw_tiles = HW // hw_tile
    n_steps = N // n_blk

    def x_map(c, n, t):
        return (n, c, t)

    def chan_map(c, n, t):
        return (c, 0)

    x_spec = pl.BlockSpec((n_blk, c_tile, hw_tile), x_map)
    chan_spec = pl.BlockSpec((c_tile, 1), chan_map)

    # Pass 1: per-channel sum/sumsq accumulated in the resident output blocks and
    # finalized in place into fused scale/bias (gamma/beta fused into this pass).
    scale, bias = pl.pallas_call(
        _make_stats_kernel(inv_count, eps),
        out_shape=(
            jax.ShapeDtypeStruct((C, 1), jnp.float32),
            jax.ShapeDtypeStruct((C, 1), jnp.float32),
        ),
        grid_spec=pltpu.PrefetchScalarGridSpec(
            num_scalar_prefetch=0,
            grid=(c_tiles, n_steps, hw_tiles),
            in_specs=[x_spec, chan_spec, chan_spec],
            out_specs=(chan_spec, chan_spec),
        ),
        compiler_params=cparams(("parallel", "arbitrary", "arbitrary")),
    )(x3, g2, b2)

    # Pass 2: elementwise y = x*scale + bias.
    out3 = pl.pallas_call(
        _normalize_kernel,
        out_shape=jax.ShapeDtypeStruct((N, C, HW), x.dtype),
        grid_spec=pltpu.PrefetchScalarGridSpec(
            num_scalar_prefetch=0,
            grid=(c_tiles, n_steps, hw_tiles),
            in_specs=[x_spec, chan_spec, chan_spec],
            out_specs=x_spec,
        ),
        compiler_params=cparams(("parallel", "parallel", "parallel")),
    )(x3, scale, bias)

    return out3.reshape(N, C, H, W)


# ---------------------------------------------------------------------------
# Self-test
# ---------------------------------------------------------------------------
def _reference(x, gamma, beta, eps=EPS):
    C = x.shape[1]
    mean = jnp.mean(x, axis=(0, 2, 3), keepdims=True)
    var = jnp.mean((x - mean) ** 2, axis=(0, 2, 3), keepdims=True)
    return (x - mean) / jnp.sqrt(var + eps) * gamma.reshape(1, C, 1, 1) + beta.reshape(
        1, C, 1, 1
    )


if __name__ == "__main__":
    key = jax.random.PRNGKey(0)
    N, C, H, W = 2, 4, 16, 16
    x = jax.random.normal(key, (N, C, H, W), dtype=jnp.float32)

    # Deterministic params matching nn.Parameter(torch.ones/zeros) in __init__.
    gamma = jnp.ones((C,), dtype=jnp.float32)
    beta = jnp.zeros((C,), dtype=jnp.float32)

    # Fused single-read path (slab fits the VMEM budget at this shape).
    out_fused = batchnorm_parallel_2d(x, gamma, beta)
    jax.block_until_ready(out_fused)

    # Two-pass (stats + normalize) path, forced for coverage at this small shape.
    out_two = batchnorm_parallel_2d(x, gamma, beta, force_two_pass=True)
    jax.block_until_ready(out_two)

    ref = _reference(x, gamma, beta)
    assert jnp.allclose(out_fused, ref, atol=1e-4, rtol=1e-4), "fused path mismatch"
    assert jnp.allclose(out_two, ref, atol=1e-4, rtol=1e-4), "two-pass path mismatch"

    # TODO(synk): backward pass (bn_backward_conv_parallel) not implemented here.
    print("KERNEL_OK")
</pallas_src>

<mosaic_0001>
module attributes {stable_mosaic.version = 11 : i64} {
  func.func @kernel(%arg0: i32, %arg1: memref<2x4x256xf32, #tpu.memory_space<vmem>>, %arg2: memref<4x1xf32, #tpu.memory_space<vmem>>, %arg3: memref<4x1xf32, #tpu.memory_space<vmem>>, %arg4: memref<2x4x256xf32, #tpu.memory_space<vmem>>) attributes {dimension_semantics = [#tpu.dimension_semantics<parallel>], iteration_bounds = array<i64: 1>, scalar_prefetch = 0 : i64, scratch_operands = 0 : i64, tpu.core_type = #tpu.core_type<tc>, window_params = [{transform_indices = @transform_0, window_bounds = array<i64: 2, 4, 256>}, {transform_indices = @transform_1, window_bounds = array<i64: 4, 1>}, {transform_indices = @transform_2, window_bounds = array<i64: 4, 1>}, {transform_indices = @transform_3, window_bounds = array<i64: 2, 4, 256>}]} {
    %c0 = arith.constant 0 : index
    %c0_0 = arith.constant 0 : index
    %c0_1 = arith.constant 0 : index
    %0 = vector.load %arg1[%c0, %c0_0, %c0_1] : memref<2x4x256xf32, #tpu.memory_space<vmem>>, vector<2x4x256xf32>
    %cst = arith.constant dense<0.000000e+00> : vector<2x4xf32>
    %1 = vector.multi_reduction <add>, %0, %cst [2] : vector<2x4x256xf32> to vector<2x4xf32>
    %2 = vector.shape_cast %1 : vector<2x4xf32> to vector<2x4x1xf32>
    %3 = arith.mulf %0, %0 : vector<2x4x256xf32>
    %cst_2 = arith.constant dense<0.000000e+00> : vector<2x4xf32>
    %4 = vector.multi_reduction <add>, %3, %cst_2 [2] : vector<2x4x256xf32> to vector<2x4xf32>
    %5 = vector.shape_cast %4 : vector<2x4xf32> to vector<2x4x1xf32>
    %cst_3 = arith.constant dense<0.000000e+00> : vector<4x1xf32>
    %6 = vector.multi_reduction <add>, %2, %cst_3 [0] : vector<2x4x1xf32> to vector<4x1xf32>
    %cst_4 = arith.constant dense<0.000000e+00> : vector<4x1xf32>
    %7 = vector.multi_reduction <add>, %5, %cst_4 [0] : vector<2x4x1xf32> to vector<4x1xf32>
    %cst_5 = arith.constant 0.001953125 : f32
    %8 = vector.broadcast %cst_5 : f32 to vector<4x1xf32>
    %9 = arith.mulf %6, %8 : vector<4x1xf32>
    %cst_6 = arith.constant 0.001953125 : f32
    %10 = vector.broadcast %cst_6 : f32 to vector<4x1xf32>
    %11 = arith.mulf %7, %10 : vector<4x1xf32>
    %12 = arith.mulf %9, %9 : vector<4x1xf32>
    %13 = arith.subf %11, %12 : vector<4x1xf32>
    %cst_7 = arith.constant 0.000000e+00 : f32
    %14 = vector.broadcast %cst_7 : f32 to vector<4x1xf32>
    %15 = arith.maximumf %13, %14 : vector<4x1xf32>
    %cst_8 = arith.constant 9.99999974E-6 : f32
    %16 = vector.broadcast %cst_8 : f32 to vector<4x1xf32>
    %17 = arith.addf %15, %16 : vector<4x1xf32>
    %18 = math.rsqrt %17 : vector<4x1xf32>
    %c0_9 = arith.constant 0 : index
    %c0_10 = arith.constant 0 : index
    %19 = vector.load %arg2[%c0_9, %c0_10] : memref<4x1xf32, #tpu.memory_space<vmem>>, vector<4x1xf32>
    %c0_11 = arith.constant 0 : index
    %c0_12 = arith.constant 0 : index
    %20 = vector.load %arg3[%c0_11, %c0_12] : memref<4x1xf32, #tpu.memory_space<vmem>>, vector<4x1xf32>
    %21 = arith.mulf %19, %18 : vector<4x1xf32>
    %22 = vector.shape_cast %21 : vector<4x1xf32> to vector<1x4x1xf32>
    %23 = arith.mulf %19, %18 : vector<4x1xf32>
    %24 = arith.mulf %9, %23 : vector<4x1xf32>
    %25 = arith.subf %20, %24 : vector<4x1xf32>
    %26 = vector.shape_cast %25 : vector<4x1xf32> to vector<1x4x1xf32>
    %27 = vector.broadcast %22 : vector<1x4x1xf32> to vector<2x4x256xf32>
    %28 = arith.mulf %0, %27 : vector<2x4x256xf32>
    %29 = vector.broadcast %26 : vector<1x4x1xf32> to vector<2x4x256xf32>
    %30 = arith.addf %28, %29 : vector<2x4x256xf32>
    %c0_13 = arith.constant 0 : index
    %c0_14 = arith.constant 0 : index
    %c0_15 = arith.constant 0 : index
    %31 = vector.load %arg4[%c0_13, %c0_14, %c0_15] : memref<2x4x256xf32, #tpu.memory_space<vmem>>, vector<2x4x256xf32>
    tpu.vector_store %arg4[%c0_13, %c0_14, %c0_15], %30 {strides = array<i32>} : memref<2x4x256xf32, #tpu.memory_space<vmem>>, vector<2x4x256xf32>,
    return
  }
  func.func @transform_0(%arg0: i32) -> (i32, i32, i32) {
    %c0_i32 = arith.constant 0 : i32
    %c0_i32_0 = arith.constant 0 : i32
    %c0_i32_1 = arith.constant 0 : i32
    return %c0_i32, %arg0, %c0_i32_0 : i32, i32, i32
  }
  func.func @transform_1(%arg0: i32) -> (i32, i32) {
    %c0_i32 = arith.constant 0 : i32
    %c0_i32_0 = arith.constant 0 : i32
    return %arg0, %c0_i32 : i32, i32
  }
  func.func @transform_2(%arg0: i32) -> (i32, i32) {
    %c0_i32 = arith.constant 0 : i32
    %c0_i32_0 = arith.constant 0 : i32
    return %arg0, %c0_i32 : i32, i32
  }
  func.func @transform_3(%arg0: i32) -> (i32, i32, i32) {
    %c0_i32 = arith.constant 0 : i32
    %c0_i32_0 = arith.constant 0 : i32
    %c0_i32_1 = arith.constant 0 : i32
    return %c0_i32, %arg0, %c0_i32_0 : i32, i32, i32
  }
}

</mosaic_0001>

<bundles_post_ra>
// kernel: batchnorm_parallel_2d.1
= control target key start
LH: loop header
LB: loop body
LE: loop exit
PB: predicated region body
PF: predicated region fallthrough
CT: control target
= control target key end

     0   :  { %vm22_vm0 = vcmask 1043456   ;;  %v111_v20 = vmov 0   ;;  %v112_v43 = vmov 839922192   ;;  %v76_v45 = vlaneseq  ;;  %s179_s0 = inlined_call_operand.vmem [shape: f32[2,4,256], index: 0, kind: input, shape index: {}]   ;;  %s180_s1 = inlined_call_operand.vmem [shape: f32[4,1], index: 1, kind: input, shape index: {}]   ;;  %s181_s2 = inlined_call_operand.vmem [shape: f32[4,1], index: 2, kind: input, shape index: {}]   ;;  %s182_s3 = inlined_call_operand.vmem [shape: f32[2,4,256], index: 3, kind: output, shape index: {}]  }
   0x1   :  { %v136_v0 = vld [vmem:[%s179_s0] sm:$0xff]  ;;  %v141_v1 = vld [vmem:[%s179_s0 + $0x8] sm:$0xff]  ;;  %105 = vset.pattern.permute.xlu0 %v111_v20  ;;  %106 = vset.pattern.permute.xlu1 %v111_v20  ;;  %v74_v44 = vunpack.c.l.s4 %v112_v43 }
   0x2   :  { %v18_v2 = vcombine.high %v136_v0, %v136_v0  ;;  %v23_v3 = vsel %vm22_vm0, %v136_v0, 0.0  ;;  %v33_v4 = vmul.f32 %v136_v0, %v136_v0  ;;  %v19_v5 = vcombine.high %v141_v1, %v141_v1  ;;  %v64_v37 = vld [vmem:[%s180_s1] sm:$0xf] }
   0x3   :  { %v28_v6 = vsel %vm22_vm0, %v141_v1, 0.0  ;;  %v34_v7 = vmul.f32 %v141_v1, %v141_v1  ;;  %v65_v40 = vld [vmem:[%s181_s2] sm:$0xf]  ;;  %v75_v46 = vunpack.c.0.s8 %v74_v44  ;;  %v77_v47 = vshrl.u32 %v76_v45, 7 }
   0x4   :  { %v24_v8 = vsel %vm22_vm0, %v18_v2, 0.0  ;;  %v37_v9 = vcombine.high %v33_v4, %v33_v4  ;;  %v41_v10 = vsel %vm22_vm0, %v33_v4, 0.0  ;;  %v29_v11 = vsel %vm22_vm0, %v19_v5, 0.0 }
   0x5   :  { %v25_v12 = vadd.f32 %v24_v8, %v23_v3  ;;  %v38_v13 = vcombine.high %v34_v7, %v34_v7  ;;  %v46_v15 = vsel %vm22_vm0, %v34_v7, 0.0  ;;  %v30_v17 = vadd.f32 %v29_v11, %v28_v6 }
   0x6   :  { %v42_v14 = vsel %vm22_vm0, %v37_v9, 0.0  ;;  %v78_v48 = vsub.s32 %v75_v46, %v77_v47 }
   0x7   :  { %26 = vadd.xlane.f32.xlu0 %v25_v12  ;;  %v43_v16 = vadd.f32 %v42_v14, %v41_v10  ;;  %v47_v18 = vsel %vm22_vm0, %v38_v13, 0.0 }
   0x8   :  { %v48_v19 = vadd.f32 %v47_v18, %v46_v15 }
   0x9   :  { %44 = vadd.xlane.f32.xlu1 %v43_v16 }
   0xb   :  { %31 = vadd.xlane.f32.xlu0 %v30_v17 }
   0xd   :  { %49 = vadd.xlane.f32.xlu1 %v48_v19 }
  0x90   :  { %v27_v21 = vpop.xlane.xlu0 %26 }
  0x91   :  { %v51_v24 = vsel %vm22_vm0, %v27_v21, 0.0 }
  0x92   :  { %v45_v22 = vpop.xlane.xlu1 %44 }
  0x93   :  { %v54_v28 = vsel %vm22_vm0, %v45_v22, 0.0 }
  0x94   :  { %v32_v23 = vpop.xlane.xlu0 %31 }
  0x95   :  { %v52_v25 = vsel %vm22_vm0, %v32_v23, 0.0 }
  0x96   :  { %v53_v26 = vadd.f32 %v52_v25, %v51_v24  ;;  %v50_v27 = vpop.xlane.xlu1 %49 }
  0x97   :  { %v55_v29 = vsel %vm22_vm0, %v50_v27, 0.0 }
  0x98   :  { %v57_v30 = vmul.f32 0.001953125, %v53_v26  ;;  %v56_v31 = vadd.f32 %v55_v29, %v54_v28 }
  0x9a   :  { %v59_v32 = vmul.f32 %v57_v30, %v57_v30  ;;  %v58_v33 = vmul.f32 0.001953125, %v56_v31 }
  0x9c   :  { %v60_v34 = vsub.f32 %v58_v33, %v59_v32 }
  0x9e   :  { %v61_v35 = vmax.f32 %v60_v34, 0.0 }
  0xa0   :  { %v62_v36 = vadd.f32 1e-05, %v61_v35 }
  0xa2   :  { %109 = vrsqrt.f32 %v62_v36 }
  0xaf   :  { %v110_v38 = vpop.eup %109 }
  0xb0   :  { %v66_v39 = vmul.f32 %v110_v38, %v64_v37 }
  0xb2   :  { %71 = vperm.xlu0 %105, %v66_v39   ;;  %v67_v41 = vmul.f32 %v66_v39, %v57_v30 }
  0xb4   :  { %v68_v42 = vsub.f32 %v65_v40, %v67_v41 }
  0xb6   :  { %85 = vperm.xlu1 %106, %v68_v42  }
 0x12d   :  { %v72_v49 = vpop.permute.xlu0 %71 }
 0x12e   :  { %v79_v50 = vrot.slane %v72_v49, %v78_v48 }
 0x130   :  { %v81_v52 = vmul.f32 %v79_v50, %v136_v0  ;;  %v82_v53 = vmul.f32 %v79_v50, %v141_v1 }
 0x131   :  { %v86_v51 = vpop.permute.xlu1 %85 }
 0x132   :  { %v93_v54 = vrot.slane %v86_v51, %v78_v48 }
 0x134   :  { %v95_v55 = vadd.f32 %v93_v54, %v81_v52  ;;  %v96_v56 = vadd.f32 %v93_v54, %v82_v53 }
 0x136   :  { %97 = vst [vmem:[%s182_s3] sm:$0xff] %v95_v55  ;;  %98 = vst [vmem:[%s182_s3 + $0x8] sm:$0xff] %v96_v56 }

</bundles_post_ra>
